<compile_context>
chip_gen: v7x
topology: tpu7x:2x2x1
jax: 0.10.0
libtpu: 0.0.40
codegen_flags: <defaults>
</compile_context>

<pallas_src>
import jax
import jax.numpy as jnp
from jax.experimental import pallas as pl
from jax.experimental.pallas import tpu as pltpu

INPUT_DIM = 63
IN_PAD = 64          # feature dim padded for aligned vreg layout / clean DMA
HIDDEN1 = 128
HIDDEN2 = 64
# TODO(synk): len(label_classes) not given in the original snippet; assuming 26 (ASL A-Z).
NUM_CLASSES = 26
OUT_PAD = 128        # lane-dense output width (unmasked vst), sliced in wrapper
TILE_M = 512         # rows per batch tile (VMEM footprint ~1.5 MiB double-buffered)


def _round_up(n, m):
    return ((n + m - 1) // m) * m


def mlp_kernel(x_ref, w1_ref, b1_ref, w2_ref, b2_ref, w3_ref, b3_ref, o_ref):
    # Layer 1: Linear(64 -> 128) + ReLU  (MXU matmul, f32 accumulate, VPU max)
    h1 = jnp.dot(x_ref[...], w1_ref[...], preferred_element_type=jnp.float32)
    h1 = jnp.maximum(h1 + b1_ref[...], 0.0)
    # Layer 2: Linear(128 -> 64) + ReLU
    h2 = jnp.dot(h1.astype(w2_ref.dtype), w2_ref[...],
                 preferred_element_type=jnp.float32)
    h2 = jnp.maximum(h2 + b2_ref[...], 0.0)
    # Layer 3: Linear(64 -> 128-padded logits), no activation
    out = jnp.dot(h2.astype(w3_ref.dtype), w3_ref[...],
                  preferred_element_type=jnp.float32)
    o_ref[...] = (out + b3_ref[...]).astype(o_ref.dtype)


def prepare_params(params, *, compute_dtype=jnp.float32):
    """One-time weight padding / casting, kept out of the per-call hot path.

    params: dict with w1 (63,128), b1 (1,128), w2 (128,64), b2 (1,64),
            w3 (64,C), b3 (1,C) in (in, out) layout.
    """
    num_classes = params["w3"].shape[1]
    prepped = {
        "num_classes": num_classes,
        # w1 rows 63 -> 64 (zero rows match zero-padded x features)
        "w1": jnp.pad(params["w1"], ((0, IN_PAD - INPUT_DIM), (0, 0))).astype(compute_dtype),
        "w2": params["w2"].astype(compute_dtype),
        # w3/b3 cols num_classes -> 128 (lane-dense output)
        "w3": jnp.pad(params["w3"], ((0, 0), (0, OUT_PAD - num_classes))).astype(compute_dtype),
        # biases stay f32 (bias-add / ReLU done in f32 on the VPU)
        "b1": params["b1"].astype(jnp.float32),
        "b2": params["b2"].astype(jnp.float32),
        "b3": jnp.pad(params["b3"], ((0, 0), (0, OUT_PAD - num_classes))).astype(jnp.float32),
        "compute_dtype": compute_dtype,
    }
    return prepped


def asl_classifier_forward(x, prepped, *, tile_m=TILE_M):
    """x: (B, 63); prepped: output of prepare_params().

    Returns (B, num_classes) float32 logits.
    """
    B = x.shape[0]
    num_classes = prepped["num_classes"]
    compute_dtype = prepped["compute_dtype"]

    # Tile choice: small batches -> single tile (rounded to sublane multiple of 8);
    # large batches -> stream tile_m-row tiles across the grid.
    tm = min(tile_m, _round_up(B, 8))
    b_pad = _round_up(B, tm)

    # Host-side zero padding of the activations only (weights already prepped):
    #   batch -> multiple of tm, features 63 -> 64.
    x_p = jnp.pad(x, ((0, b_pad - B), (0, IN_PAD - INPUT_DIM))).astype(compute_dtype)

    grid = (b_pad // tm,)

    out = pl.pallas_call(
        mlp_kernel,
        out_shape=jax.ShapeDtypeStruct((b_pad, OUT_PAD), jnp.float32),
        grid_spec=pltpu.PrefetchScalarGridSpec(
            num_scalar_prefetch=0,
            grid=grid,
            in_specs=[
                # streamed per batch tile
                pl.BlockSpec((tm, IN_PAD), lambda i: (i, 0)),
                # weights/biases: constant block index -> VMEM-resident, DMA'd once
                pl.BlockSpec((IN_PAD, HIDDEN1), lambda i: (0, 0)),
                pl.BlockSpec((1, HIDDEN1), lambda i: (0, 0)),
                pl.BlockSpec((HIDDEN1, HIDDEN2), lambda i: (0, 0)),
                pl.BlockSpec((1, HIDDEN2), lambda i: (0, 0)),
                pl.BlockSpec((HIDDEN2, OUT_PAD), lambda i: (0, 0)),
                pl.BlockSpec((1, OUT_PAD), lambda i: (0, 0)),
            ],
            out_specs=pl.BlockSpec((tm, OUT_PAD), lambda i: (i, 0)),
        ),
        compiler_params=pltpu.CompilerParams(
            dimension_semantics=("parallel",),
        ),
    )(x_p, prepped["w1"], prepped["b1"], prepped["w2"], prepped["b2"],
      prepped["w3"], prepped["b3"])

    # strip batch padding and the zero-padded logit lanes
    return out[:B, :num_classes]


def init_params(key, num_classes=NUM_CLASSES):
    """Deterministic, PyTorch-Linear-like init (uniform +/- 1/sqrt(fan_in))."""
    ks = jax.random.split(key, 6)

    def linear(kw, kb, fan_in, fan_out):
        bound = 1.0 / jnp.sqrt(fan_in)
        w = jax.random.uniform(kw, (fan_in, fan_out), jnp.float32, -bound, bound)
        b = jax.random.uniform(kb, (1, fan_out), jnp.float32, -bound, bound)
        return w, b

    w1, b1 = linear(ks[0], ks[1], INPUT_DIM, HIDDEN1)
    w2, b2 = linear(ks[2], ks[3], HIDDEN1, HIDDEN2)
    w3, b3 = linear(ks[4], ks[5], HIDDEN2, num_classes)
    return {"w1": w1, "b1": b1, "w2": w2, "b2": b2, "w3": w3, "b3": b3}


def _reference(x, params):
    h = jnp.maximum(x @ params["w1"] + params["b1"], 0.0)
    h = jnp.maximum(h @ params["w2"] + params["b2"], 0.0)
    return h @ params["w3"] + params["b3"]


if __name__ == "__main__":
    key = jax.random.PRNGKey(0)
    k_params, k_x1, k_x2 = jax.random.split(key, 3)
    params = init_params(k_params)

    # Small-batch check (single grid tile), f32 end-to-end.
    prepped_f32 = prepare_params(params)
    batch = 8
    x = jax.random.normal(k_x1, (batch, INPUT_DIM), jnp.float32)
    logits = asl_classifier_forward(x, prepped_f32)
    jax.block_until_ready(logits)
    ref = _reference(x, params)
    assert logits.shape == (batch, NUM_CLASSES)
    assert jnp.allclose(logits, ref, atol=1e-5, rtol=1e-5)

    # Multi-tile check (grid > 1, batch not a multiple of the tile), f32.
    batch2 = 1000
    x2 = jax.random.normal(k_x2, (batch2, INPUT_DIM), jnp.float32)
    logits2 = asl_classifier_forward(x2, prepped_f32, tile_m=256)
    jax.block_until_ready(logits2)
    ref2 = _reference(x2, params)
    assert logits2.shape == (batch2, NUM_CLASSES)
    assert jnp.allclose(logits2, ref2, atol=1e-4, rtol=1e-4)

    # bf16 matmul operands with f32 accumulation (halves HBM traffic on v6e/v7x).
    prepped_bf16 = prepare_params(params, compute_dtype=jnp.bfloat16)
    logits_bf16 = asl_classifier_forward(x2, prepped_bf16, tile_m=256)
    jax.block_until_ready(logits_bf16)
    assert logits_bf16.shape == (batch2, NUM_CLASSES)
    assert jnp.allclose(logits_bf16, ref2, atol=2e-1, rtol=2e-1)

    print("KERNEL_OK")
</pallas_src>

<mosaic_0001>
module attributes {stable_mosaic.version = 11 : i64} {
  func.func @mlp_kernel(%arg0: i32, %arg1: memref<8x64xf32, #tpu.memory_space<vmem>>, %arg2: memref<64x128xf32, #tpu.memory_space<vmem>>, %arg3: memref<1x128xf32, #tpu.memory_space<vmem>>, %arg4: memref<128x64xf32, #tpu.memory_space<vmem>>, %arg5: memref<1x64xf32, #tpu.memory_space<vmem>>, %arg6: memref<64x128xf32, #tpu.memory_space<vmem>>, %arg7: memref<1x128xf32, #tpu.memory_space<vmem>>, %arg8: memref<8x128xf32, #tpu.memory_space<vmem>>) attributes {dimension_semantics = [#tpu.dimension_semantics<parallel>], iteration_bounds = array<i64: 1>, scalar_prefetch = 0 : i64, scratch_operands = 0 : i64, tpu.core_type = #tpu.core_type<tc>, window_params = [{transform_indices = @transform_0, window_bounds = array<i64: 8, 64>}, {pipeline_mode = #tpu.pipeline_mode<synchronous>, transform_indices = @transform_1, window_bounds = array<i64: 64, 128>}, {pipeline_mode = #tpu.pipeline_mode<synchronous>, transform_indices = @transform_2, window_bounds = array<i64: 1, 128>}, {pipeline_mode = #tpu.pipeline_mode<synchronous>, transform_indices = @transform_3, window_bounds = array<i64: 128, 64>}, {pipeline_mode = #tpu.pipeline_mode<synchronous>, transform_indices = @transform_4, window_bounds = array<i64: 1, 64>}, {pipeline_mode = #tpu.pipeline_mode<synchronous>, transform_indices = @transform_5, window_bounds = array<i64: 64, 128>}, {pipeline_mode = #tpu.pipeline_mode<synchronous>, transform_indices = @transform_6, window_bounds = array<i64: 1, 128>}, {transform_indices = @transform_7, window_bounds = array<i64: 8, 128>}]} {
    %c0 = arith.constant 0 : index
    %c0_0 = arith.constant 0 : index
    %0 = vector.load %arg1[%c0, %c0_0] : memref<8x64xf32, #tpu.memory_space<vmem>>, vector<8x64xf32>
    %c0_1 = arith.constant 0 : index
    %c0_2 = arith.constant 0 : index
    %1 = vector.load %arg2[%c0_1, %c0_2] : memref<64x128xf32, #tpu.memory_space<vmem>>, vector<64x128xf32>
    %cst = arith.constant dense<0.000000e+00> : vector<8x128xf32>
    %2 = tpu.matmul %0, %1, %cst {dimension_numbers = #tpu.dot_dimension_numbers<[1], [0], [0], [1], [0, 0, 1, 1], [], []>} : vector<8x64xf32>, vector<64x128xf32>, vector<8x128xf32> -> vector<8x128xf32>
    %c0_3 = arith.constant 0 : index
    %c0_4 = arith.constant 0 : index
    %3 = vector.load %arg3[%c0_3, %c0_4] : memref<1x128xf32, #tpu.memory_space<vmem>>, vector<1x128xf32>
    %4 = vector.broadcast %3 : vector<1x128xf32> to vector<8x128xf32>
    %5 = arith.addf %2, %4 : vector<8x128xf32>
    %cst_5 = arith.constant 0.000000e+00 : f32
    %6 = vector.broadcast %cst_5 : f32 to vector<8x128xf32>
    %7 = arith.maximumf %5, %6 : vector<8x128xf32>
    %c0_6 = arith.constant 0 : index
    %c0_7 = arith.constant 0 : index
    %8 = vector.load %arg4[%c0_6, %c0_7] : memref<128x64xf32, #tpu.memory_space<vmem>>, vector<128x64xf32>
    %cst_8 = arith.constant dense<0.000000e+00> : vector<8x64xf32>
    %9 = tpu.matmul %7, %8, %cst_8 {dimension_numbers = #tpu.dot_dimension_numbers<[1], [0], [0], [1], [0, 0, 1, 1], [], []>} : vector<8x128xf32>, vector<128x64xf32>, vector<8x64xf32> -> vector<8x64xf32>
    %c0_9 = arith.constant 0 : index
    %c0_10 = arith.constant 0 : index
    %10 = vector.load %arg5[%c0_9, %c0_10] : memref<1x64xf32, #tpu.memory_space<vmem>>, vector<1x64xf32>
    %11 = vector.broadcast %10 : vector<1x64xf32> to vector<8x64xf32>
    %12 = arith.addf %9, %11 : vector<8x64xf32>
    %cst_11 = arith.constant 0.000000e+00 : f32
    %13 = vector.broadcast %cst_11 : f32 to vector<8x64xf32>
    %14 = arith.maximumf %12, %13 : vector<8x64xf32>
    %c0_12 = arith.constant 0 : index
    %c0_13 = arith.constant 0 : index
    %15 = vector.load %arg6[%c0_12, %c0_13] : memref<64x128xf32, #tpu.memory_space<vmem>>, vector<64x128xf32>
    %cst_14 = arith.constant dense<0.000000e+00> : vector<8x128xf32>
    %16 = tpu.matmul %14, %15, %cst_14 {dimension_numbers = #tpu.dot_dimension_numbers<[1], [0], [0], [1], [0, 0, 1, 1], [], []>} : vector<8x64xf32>, vector<64x128xf32>, vector<8x128xf32> -> vector<8x128xf32>
    %c0_15 = arith.constant 0 : index
    %c0_16 = arith.constant 0 : index
    %17 = vector.load %arg7[%c0_15, %c0_16] : memref<1x128xf32, #tpu.memory_space<vmem>>, vector<1x128xf32>
    %18 = vector.broadcast %17 : vector<1x128xf32> to vector<8x128xf32>
    %19 = arith.addf %16, %18 : vector<8x128xf32>
    %c0_17 = arith.constant 0 : index
    %c0_18 = arith.constant 0 : index
    %20 = vector.load %arg8[%c0_17, %c0_18] : memref<8x128xf32, #tpu.memory_space<vmem>>, vector<8x128xf32>
    tpu.vector_store %arg8[%c0_17, %c0_18], %19 {strides = array<i32>} : memref<8x128xf32, #tpu.memory_space<vmem>>, vector<8x128xf32>,
    return
  }
  func.func @transform_0(%arg0: i32) -> (i32, i32) {
    %c0_i32 = arith.constant 0 : i32
    %c0_i32_0 = arith.constant 0 : i32
    return %arg0, %c0_i32 : i32, i32
  }
  func.func @transform_1(%arg0: i32) -> (i32, i32) {
    %c0_i32 = arith.constant 0 : i32
    %c0_i32_0 = arith.constant 0 : i32
    %c0_i32_1 = arith.constant 0 : i32
    return %c0_i32, %c0_i32_0 : i32, i32
  }
  func.func @transform_2(%arg0: i32) -> (i32, i32) {
    %c0_i32 = arith.constant 0 : i32
    %c0_i32_0 = arith.constant 0 : i32
    %c0_i32_1 = arith.constant 0 : i32
    return %c0_i32, %c0_i32_0 : i32, i32
  }
  func.func @transform_3(%arg0: i32) -> (i32, i32) {
    %c0_i32 = arith.constant 0 : i32
    %c0_i32_0 = arith.constant 0 : i32
    %c0_i32_1 = arith.constant 0 : i32
    return %c0_i32, %c0_i32_0 : i32, i32
  }
  func.func @transform_4(%arg0: i32) -> (i32, i32) {
    %c0_i32 = arith.constant 0 : i32
    %c0_i32_0 = arith.constant 0 : i32
    %c0_i32_1 = arith.constant 0 : i32
    return %c0_i32, %c0_i32_0 : i32, i32
  }
  func.func @transform_5(%arg0: i32) -> (i32, i32) {
    %c0_i32 = arith.constant 0 : i32
    %c0_i32_0 = arith.constant 0 : i32
    %c0_i32_1 = arith.constant 0 : i32
    return %c0_i32, %c0_i32_0 : i32, i32
  }
  func.func @transform_6(%arg0: i32) -> (i32, i32) {
    %c0_i32 = arith.constant 0 : i32
    %c0_i32_0 = arith.constant 0 : i32
    %c0_i32_1 = arith.constant 0 : i32
    return %c0_i32, %c0_i32_0 : i32, i32
  }
  func.func @transform_7(%arg0: i32) -> (i32, i32) {
    %c0_i32 = arith.constant 0 : i32
    %c0_i32_0 = arith.constant 0 : i32
    return %arg0, %c0_i32 : i32, i32
  }
}

</mosaic_0001>

<bundles_post_ra>
// kernel: tpu_custom_call.1
= control target key start
LH: loop header
LB: loop body
LE: loop exit
PB: predicated region body
PF: predicated region fallthrough
CT: control target
= control target key end

     0   :  { %v504_v3 = vmov 0.0|0.0   ;;  %vm505_vm0 = vmmov 0   ;;  %v506_v6 = vmov 0.0   ;;  %s689_s0 = inlined_call_operand.vmem [shape: f32[8,64], index: 0, kind: input, shape index: {}]   ;;  %s690_s1 = inlined_call_operand.vmem [shape: f32[64,128], index: 1, kind: input, shape index: {}]   ;;  %s691_s2 = inlined_call_operand.vmem [shape: f32[1,128], index: 2, kind: input, shape index: {}]   ;;  %s692_s3 = inlined_call_operand.vmem [shape: f32[128,64], index: 3, kind: input, shape index: {}]   ;;  %s693_s4 = inlined_call_operand.vmem [shape: f32[1,64], index: 4, kind: input, shape index: {}]   ;;  %s694_s5 = inlined_call_operand.vmem [shape: f32[64,128], index: 5, kind: input, shape index: {}]   ;;  %s695_s6 = inlined_call_operand.vmem [shape: f32[1,128], index: 6, kind: input, shape index: {}]   ;;  %s696_s7 = inlined_call_operand.hbm [shape: f32[8,128], index: 7, kind: output, shape index: {}]  }
   0x1   :  { %v28_v0 = vld [vmem:[%s690_s1] sm:$0xff]  ;;  %v29_v1 = vld [vmem:[%s690_s1 + $0x8] sm:$0xff]  ;;  %v30_v2 = vld [vmem:[%s690_s1 + $0x10] sm:$0xff]  ;;  %428 = vmatprep.subr.bf16.mxu0 %v504_v3  ;;  %371 = vmatprep.mubr.msk.f32.mxu0 %vm505_vm0, %v506_v6 }
   0x2   :  { %v429_v4 = vpack.c.bf16 %v29_v1, %v28_v0  ;;  %v31_v5 = vld [vmem:[%s690_s1 + $0x18] sm:$0xff]  ;;  %440 = vmatprep.subr.bf16.mxu1 %v504_v3  ;;  %406 = vmatprep.mubr.msk.f32.mxu1 %vm505_vm0, %v506_v6  ;;  %v118_v8 = vld [vmem:[%s692_s3] sm:$0xff]  ;;  %v119_v9 = vld [vmem:[%s692_s3 + $0x8] sm:$0xff] }
   0x3   :  { %v432_v7 = vpack.c.bf16 %v31_v5, %v30_v2  ;;  %v120_v10 = vld [vmem:[%s692_s3 + $0x10] sm:$0xff]  ;;  %v32_v11 = vld [vmem:[%s690_s1 + $0x20] sm:$0xff]  ;;  %v33_v12 = vld [vmem:[%s690_s1 + $0x28] sm:$0xff]  ;;  %v441_v13 = vpack.c.bf16 %v119_v9, %v118_v8 }
   0x4   :  { %430 = vmatpush3.bf16.msra.mxu0 %v429_v4  ;;  %v121_v14 = vld [vmem:[%s692_s3 + $0x18] sm:$0xff]  ;;  %v435_v16 = vpack.c.bf16 %v33_v12, %v32_v11  ;;  %v122_v17 = vld [vmem:[%s692_s3 + $0x20] sm:$0xff]  ;;  %v123_v18 = vld [vmem:[%s692_s3 + $0x28] sm:$0xff] }
   0x5   :  { %431 = vmatprep.subr.bf16.mxu0 %v504_v3  ;;  %442 = vmatpush3.bf16.msra.mxu1 %v441_v13  ;;  %v444_v15 = vpack.c.bf16 %v121_v14, %v120_v10  ;;  %v34_v19 = vld [vmem:[%s690_s1 + $0x30] sm:$0xff]  ;;  %v35_v20 = vld [vmem:[%s690_s1 + $0x38] sm:$0xff] }
   0x6   :  { %443 = vmatprep.subr.bf16.mxu1 %v504_v3 }
   0x8   :  { %433 = vmatpush3.bf16.msra.mxu0 %v432_v7 }
   0x9   :  { %434 = vmatprep.subr.bf16.mxu0 %v504_v3 }
   0xa   :  { %12 = vsyncpa [#allocation3], 0  ;;  %445 = vmatpush3.bf16.msra.mxu1 %v444_v15  ;;  %v447_v21 = vpack.c.bf16 %v123_v18, %v122_v17  ;;  %v438_v22 = vpack.c.bf16 %v35_v20, %v34_v19  ;;  %v124_v23 = vld [vmem:[%s692_s3 + $0x30] sm:$0xff]  ;;  %v125_v24 = vld [vmem:[%s692_s3 + $0x38] sm:$0xff]  ;;  %vm43_vm1 = vcmask 523264   ;;  %s507_s21 = smov [#allocation2]  }
   0xb   :  { %446 = vmatprep.subr.bf16.mxu1 %v504_v3  ;;  %v450_v25 = vpack.c.bf16 %v125_v24, %v124_v23  ;;  %v27_v26 = vld [vmem:[%s689_s0] sm:$0xff]  ;;  %v127_v28 = vld [vmem:[%s692_s3 + $0x48] sm:$0xff]  ;;  %v128_v30 = vld [vmem:[%s692_s3 + $0x50] sm:$0xff]  ;;  %s307_s22 = sshll.u32 %s507_s21, 4  ;;  %s308_s22 = int_to_ptr.vmem [resolvable:$true] %s307_s22 }
   0xc   :  { %436 = vmatpush3.bf16.msra.mxu0 %v435_v16  ;;  %v126_v27 = vld [vmem:[%s692_s3 + $0x40] sm:$0xff]  ;;  %v129_v31 = vld [vmem:[%s692_s3 + $0x58] sm:$0xff]  ;;  %v131_v34 = vld [vmem:[%s692_s3 + $0x68] sm:$0xff]  ;;  %p485_p1 = scmp.lt.s32.totalorder %s308_s22, %s308_s22 }
   0xd   :  { %437 = vmatprep.subr.bf16.mxu0 %v504_v3  ;;  %v453_v29 = vpack.c.bf16 %v127_v28, %v126_v27  ;;  %v456_v32 = vpack.c.bf16 %v129_v31, %v128_v30  ;;  %v130_v33 = vld [vmem:[%s692_s3 + $0x60] sm:$0xff]  ;;  %v132_v36 = vld [vmem:[%s692_s3 + $0x70] sm:$0xff]  ;;  %v133_v37 = vld [vmem:[%s692_s3 + $0x78] sm:$0xff] }
   0xe   :  { %448 = vmatpush3.bf16.msra.mxu1 %v447_v21  ;;  %v459_v35 = vpack.c.bf16 %v131_v34, %v130_v33  ;;  %v462_v38 = vpack.c.bf16 %v133_v37, %v132_v36  ;;  %v212_v39 = vld [vmem:[%s694_s5] sm:$0xff]  ;;  %v213_v40 = vld [vmem:[%s694_s5 + $0x8] sm:$0xff]  ;;  %v214_v41 = vld [vmem:[%s694_s5 + $0x10] sm:$0xff] }
   0xf   :  { %449 = vmatprep.subr.bf16.mxu1 %v504_v3  ;;  %v465_v42 = vpack.c.bf16 %v213_v40, %v212_v39  ;;  %v215_v43 = vld [vmem:[%s694_s5 + $0x18] sm:$0xff]  ;;  %v216_v45 = vld [vmem:[%s694_s5 + $0x20] sm:$0xff]  ;;  %v217_v46 = vld [vmem:[%s694_s5 + $0x28] sm:$0xff] }
  0x10   :  { %439 = vmatpush3.bf16.msra.mxu0 %v438_v22  ;;  %v468_v44 = vpack.c.bf16 %v215_v43, %v214_v41  ;;  %v471_v47 = vpack.c.bf16 %v217_v46, %v216_v45  ;;  %v315_v48 = vld [vmem:[%s691_s2] ss:$0 sm:$0xff]  ;;  %v218_v53 = vld [vmem:[%s694_s5 + $0x30] sm:$0xff]  ;;  %v219_v54 = vld [vmem:[%s694_s5 + $0x38] sm:$0xff]  ;;  %s480_s5 = scalar_lea.vmem %s308_s22, 128 }
  0x11   :  { %464 = vmatprep.subr.bf16.mxu0 %v504_v3  ;;  %v474_v55 = vpack.c.bf16 %v219_v54, %v218_v53  ;;  %v317_v56 = vld [vmem:[%s693_s4] ss:$0 sm:$0xff]  ;;  %p481_p0 = scmp.ne.s32.totalorder %s308_s22, %s480_s5  ;;  %p486_p2 = scmp.lt.s32.totalorder %s480_s5, %s480_s5 }
  0x12   :  { %451 = vmatpush3.bf16.msra.mxu1 %v450_v25  ;;  %v318_v61 = vld [vmem:[%s695_s6] ss:$0 sm:$0xff] }
  0x13   :  { %372 = vmatmul.mubr.msk.f32.vlgmr.msra.gmra.mrb[0].mxu0 %vm43_vm1, %v27_v26  ;;  %452 = vmatprep.subr.bf16.mxu1 %v504_v3  ;;  %p487_p3 = por %p486_p2, %p485_p1 }
  0x14   :  { %425 = vmatprep.mubr.msk.f32.mxu0 %vm505_vm0, %v506_v6  ;;  %466 = vmatpush3.bf16.msra.mxu0 %v465_v42 }
  0x15   :  { %467 = vmatprep.subr.bf16.mxu0 %v504_v3  ;;  %p488_p4 = pnand %p487_p3, %p481_p0 }
  0x16   :  { %454 = vmatpush3.bf16.msra.mxu1 %v453_v29 }
  0x17   :  { %455 = vmatprep.subr.bf16.mxu1 %v504_v3 }
  0x18   :  { %469 = vmatpush3.bf16.msra.mxu0 %v468_v44 }
  0x19   :  { %470 = vmatprep.subr.bf16.mxu0 %v504_v3 }
  0x1a   :  { %457 = vmatpush3.bf16.msra.mxu1 %v456_v32 }
  0x1b   :  { %458 = vmatprep.subr.bf16.mxu1 %v504_v3 }
  0x1c   :  { %472 = vmatpush3.bf16.msra.mxu0 %v471_v47 }
  0x1d   :  { %473 = vmatprep.subr.bf16.mxu0 %v504_v3 }
  0x1e   :  { %460 = vmatpush3.bf16.msra.mxu1 %v459_v35 }
  0x1f   :  { %461 = vmatprep.subr.bf16.mxu1 %v504_v3 }
  0x20   :  { %475 = vmatpush3.bf16.msra.mxu0 %v474_v55 }
  0x22   :  { %463 = vmatpush3.bf16.msra.mxu1 %v462_v38 }
  0xe6   :  { %v113_v49 = vpop.f32.mrb[0].mxu0 }
  0xe7   :  { %v114_v50 = vadd.f32 %v315_v48, %v113_v49  ;;  %v373_v51 = vpop.f32.mrb[1].mxu0 }
  0xe9   :  { %v117_v52 = vmax.f32 %v114_v50, 0.0 }
  0xeb   :  { %407 = vmatmul.mubr.f32.vlgmr.msra.gmra.mrb[0].mxu1 %v117_v52 }
 0x1be   :  { %v207_v57 = vpop.f32.mrb[0].mxu1 }
 0x1bf   :  { %v208_v58 = vadd.f32 %v317_v56, %v207_v57  ;;  %v408_v59 = vpop.f32.mrb[1].mxu1 }
 0x1c1   :  { %v211_v60 = vmax.f32 %v208_v58, 0.0 }
 0x1c3   :  { %426 = vmatmul.mubr.msk.f32.vlgmr.msra.gmra.mrb[2].mxu0 %vm43_vm1, %v211_v60 }
 0x296   :  { %v296_v62 = vpop.f32.mrb[2].mxu0 }
 0x297   :  { %v297_v63 = vadd.f32 %v318_v61, %v296_v62  ;;  %v427_v0 = vpop.f32.mrb[3].mxu0 }
 0x299   :  { %300 = vst [vmem:[#allocation2] sm:$0xff] %v297_v63 }
 0x29a   :  { %491 = shalt.err (!%p488_p4)
}
 0x29b   :  { %s492_s24 = scalar_lea.hbm %s696_s7, 128 }
 0x29c   :  { %p493_p5 = scmp.ne.s32.totalorder %s696_s7, %s492_s24  ;;  %p496_p6 = scmp.lt.u32.totalorder %s492_s24, %s696_s7 }
 0x29e   :  { %p498_p7 = pnand %p496_p6, %p493_p5 }
 0x2a0   :  { %501 = shalt.err (!%p498_p7)
}
 0x2a1   :  { %310 = dma.vmem_to_hbm [thread:$0]  %s308_s22, 128, %s696_s7, [#allocation3]  }
 0x2a2   :  { %502 = dma.done.wait [#allocation3], 128  }
 0x2a3   :  { %503 = vsyncadd [#allocation3], 4294967168 }
 0x2a4   :  { %314 = vsyncpa [#allocation3], 1 }

</bundles_post_ra>
